<compile_context>
chip_gen: v5e
topology: v5e:2x2
jax: 0.10.0
libtpu: 0.0.40
codegen_flags: <defaults>
</compile_context>

<pallas_src>
import jax
import jax.numpy as jnp
from jax.experimental import pallas as pl
from jax.experimental.pallas import tpu as pltpu


_LANE = 128


def _round_up(x: int, m: int) -> int:
    return (x + m - 1) // m * m


def _vmem_budget_and_limit():
    """Generation-aware VMEM numbers (v5e/v6e: 128 MiB, v7x: 64 MiB per core)."""
    cap = 64 * 1024 * 1024  # conservative fallback == v7x per-core VMEM
    try:
        cap = int(pltpu.get_tpu_info().vmem_capacity_bytes)
    except Exception:
        pass
    budget = min(cap * 3 // 8, 48 * 1024 * 1024)   # 48 MiB on 128 MiB parts, 24 MiB on v7x
    limit = min(cap // 2, 64 * 1024 * 1024)        # 64 MiB on 128 MiB parts, 32 MiB on v7x
    return budget, limit


def _spec(shape, index_map, buffers=None):
    """BlockSpec with an optional pipeline buffer-count override.

    buffers=1 is used for grid-invariant (resident) operands so they are not
    double-buffered; guarded so older jax versions without pipeline_mode still
    work.
    """
    if buffers is not None and hasattr(pl, "Buffered"):
        try:
            return pl.BlockSpec(shape, index_map, pipeline_mode=pl.Buffered(buffers))
        except TypeError:
            pass
    return pl.BlockSpec(shape, index_map)


def _dim_semantics(n_axes, core_parallel):
    # TODO(synk): verify on a v7x trace whether plain "parallel" already splits
    # the grid across both TensorCores; CORE_PARALLEL is exposed as an opt-in.
    if core_parallel:
        return (pltpu.CORE_PARALLEL,) + (pltpu.PARALLEL,) * (n_axes - 1)
    return ("parallel",) * n_axes


def _pick_tile_m(M, Kp, Np, in_itemsize, out_itemsize, budget_bytes):
    """Largest MXU-friendly row tile (>=128) fitting the VMEM budget.

    Prefers a tile that divides M so no M padding is needed and the epilogue
    slice is a no-op view.  Resident weight/bias are counted single-buffered;
    the streamed patch/output tiles are counted double-buffered.
    """
    m_cap = max(128, _round_up(M, 128))
    resident = in_itemsize * Kp * Np + 4 * Np
    fitting = []
    for tm in (2048, 1024, 512, 256, 128):
        if tm > m_cap:
            continue
        need = 2 * tm * (in_itemsize * Kp + out_itemsize * Np) + resident
        if need <= budget_bytes:
            fitting.append(tm)
    if not fitting:
        return 128
    for tm in fitting:                 # largest first; prefer exact division of M
        if M % tm == 0:
            return tm
    return fitting[0]


def _auto_fuse(B, Ho, C, ph, M, K, itemsize):
    """Heuristic: fuse only when skipping the HBM patch-matrix pass clearly
    beats the fused path's per-step overhead and MXU underfill."""
    if C * ph > 64:                                   # unrolled dot count per strip
        return False
    saved_s = 2.0 * M * K * itemsize / 1.0e12         # skipped write+read @ ~1 TB/s
    added_s = 3.0 * (B * Ho) * 0.35e-6                # grid-step overhead x MXU-waste fudge
    return saved_s > added_s


# --------------------------------------------------------------------------
# Kernels
# --------------------------------------------------------------------------

def _matmul_bias_kernel(x_ref, w_ref, b_ref, o_ref):
    # x_ref: (tile_m, Kp) patch tile; w_ref: (Kp, Np) resident weight;
    # b_ref: (1, Np) resident f32 bias; o_ref: (tile_m, Np).
    acc = jnp.dot(x_ref[...], w_ref[...], preferred_element_type=jnp.float32)
    o_ref[...] = (acc + b_ref[...]).astype(o_ref.dtype)


def _fused_patch_embed_kernel(x_ref, w_ref, b_ref, o_ref):
    # x_ref: (1, C, 1, ph, Wo, pw) raw image strip (one row of patches)
    # w_ref: (C, ph, pw, Np) resident weight; b_ref: (1, Np) resident f32 bias
    # o_ref: (1, 1, Wo, Np)
    _, C, _, ph, Wo, _ = x_ref.shape
    Np = o_ref.shape[-1]
    acc = jnp.zeros((Wo, Np), jnp.float32)
    for c in range(C):                       # static unroll: C*ph rank-2 dots,
        for dh in range(ph):                 # leading-dim slices only (safe lowering)
            lhs = x_ref[0, c, 0, dh].astype(w_ref.dtype)          # (Wo, pw)
            acc = acc + jnp.dot(lhs, w_ref[c, dh],
                                preferred_element_type=jnp.float32)
    o_ref[0, 0] = (acc + b_ref[...]).astype(o_ref.dtype)


# --------------------------------------------------------------------------
# Host-side paths
# --------------------------------------------------------------------------

def _patch_embed_im2col(x, weight, b_mat, ph, pw, Np, cdt, out_dtype, budget,
                        vmem_limit, tile_m, single_buffer_resident,
                        stream_buffers, core_parallel):
    B, C, H, W = x.shape
    Ho, Wo = H // ph, W // pw
    N = weight.shape[0]
    M, K = B * Ho * Wo, C * ph * pw
    Kp = _round_up(K, _LANE)                 # lane-dense loads, bf16/int8 packing safe

    in_itemsize = jnp.dtype(cdt).itemsize
    out_itemsize = jnp.dtype(out_dtype).itemsize
    if tile_m is None:
        tile_m = _pick_tile_m(M, Kp, Np, in_itemsize, out_itemsize, budget)
    Mp = _round_up(M, tile_m)
    grid_m = Mp // tile_m

    # im2col (one XLA producer pass): (B,C,Ho,ph,Wo,pw) -> (B,Ho,Wo,C,ph,pw) -> (M,K);
    # the (C, ph, pw) flatten order matches the Conv2d OIHW weight layout.
    xp = jnp.transpose(x.reshape(B, C, Ho, ph, Wo, pw), (0, 2, 4, 1, 3, 5))
    patches = xp.reshape(M, K).astype(cdt)
    if Mp != M or Kp != K:
        patches = jnp.pad(patches, ((0, Mp - M), (0, Kp - K)))

    w_mat = jnp.transpose(weight.reshape(N, K)).astype(cdt)       # (K, N)
    if Kp != K or Np != N:
        w_mat = jnp.pad(w_mat, ((0, Kp - K), (0, Np - N)))

    cost = pl.CostEstimate(
        flops=2 * Mp * Kp * Np,
        transcendentals=0,
        bytes_accessed=(in_itemsize * (Mp * Kp + Kp * Np) + 4 * Np
                        + out_itemsize * Mp * Np))

    rb = 1 if single_buffer_resident else None
    out = pl.pallas_call(
        _matmul_bias_kernel,
        out_shape=jax.ShapeDtypeStruct((Mp, Np), out_dtype),
        grid=(grid_m,),
        in_specs=[
            _spec((tile_m, Kp), lambda i: (i, 0), buffers=stream_buffers),
            _spec((Kp, Np), lambda i: (0, 0), buffers=rb),        # resident weight
            _spec((1, Np), lambda i: (0, 0), buffers=rb),         # resident bias
        ],
        out_specs=pl.BlockSpec((tile_m, Np), lambda i: (i, 0)),
        compiler_params=pltpu.CompilerParams(
            dimension_semantics=_dim_semantics(1, core_parallel),
            vmem_limit_bytes=vmem_limit),
        cost_estimate=cost,
    )(patches, w_mat, b_mat)

    return out[:M, :N].reshape(B, Ho * Wo, N)


def _patch_embed_fused(x, weight, b_mat, ph, pw, Np, cdt, out_dtype,
                       vmem_limit, single_buffer_resident, core_parallel):
    B, C, H, W = x.shape
    Ho, Wo = H // ph, W // pw
    N = weight.shape[0]
    K = C * ph * pw

    # Conv weight (N, C, ph, pw) -> (C, ph, pw, Np): w4[c,dh,dw,n] == weight[n,c,dh,dw].
    w4 = jnp.transpose(weight, (1, 2, 3, 0)).astype(cdt)
    if Np != N:
        w4 = jnp.pad(w4, ((0, 0), (0, 0), (0, 0), (0, Np - N)))

    # Metadata-only reshape of contiguous NCHW (no HBM pass over x).
    x6 = x.reshape(B, C, Ho, ph, Wo, pw)

    in_itemsize = jnp.dtype(x.dtype).itemsize
    cost = pl.CostEstimate(
        flops=2 * B * Ho * Wo * K * Np,
        transcendentals=0,
        bytes_accessed=(in_itemsize * B * C * H * W
                        + jnp.dtype(cdt).itemsize * K * Np + 4 * Np
                        + jnp.dtype(out_dtype).itemsize * B * Ho * Wo * Np))

    rb = 1 if single_buffer_resident else None
    out = pl.pallas_call(
        _fused_patch_embed_kernel,
        out_shape=jax.ShapeDtypeStruct((B, Ho, Wo, Np), out_dtype),
        grid=(B, Ho),
        in_specs=[
            pl.BlockSpec((1, C, 1, ph, Wo, pw), lambda b, h: (b, 0, h, 0, 0, 0)),
            _spec((C, ph, pw, Np), lambda b, h: (0, 0, 0, 0), buffers=rb),
            _spec((1, Np), lambda b, h: (0, 0), buffers=rb),
        ],
        out_specs=pl.BlockSpec((1, 1, Wo, Np), lambda b, h: (b, h, 0, 0)),
        compiler_params=pltpu.CompilerParams(
            dimension_semantics=_dim_semantics(2, core_parallel),
            vmem_limit_bytes=vmem_limit),
        cost_estimate=cost,
    )(x6, w4, b_mat)

    if Np != N:
        out = out[..., :N]
    return out.reshape(B, Ho * Wo, N)


def patch_embed(x, weight, bias, patch_size, *, mxu_dtype=jnp.bfloat16,
                tile_m=None, fuse_im2col=None, stream_buffers=None,
                core_parallel=False):
    """Forward pass of PatchEmbed (norm_layer=None).

    Args:
      x:       (B, C, H, W) NCHW image, as in the PyTorch module.
      weight:  (embed_dim, C, ph, pw) nn.Conv2d OIHW weight.
      bias:    (embed_dim,)
      patch_size: int (square patch).
      mxu_dtype: MXU operand dtype (default bf16; accumulation is always f32;
                 pass jnp.float32 or None for full-precision operands).
      tile_m:  optional row-tile override for the im2col path.
      fuse_im2col: True / False / None (auto heuristic).
      stream_buffers: optional pipeline depth for the streamed patch tiles.
      core_parallel: use pltpu.CORE_PARALLEL on the leading grid axis (v7x).

    Returns:
      (B, num_patches, embed_dim) == proj(x).flatten(2).transpose(1, 2).
    """
    B, C, H, W = x.shape
    ph = pw = int(patch_size)
    Ho, Wo = H // ph, W // pw
    N = weight.shape[0]
    M, K = B * Ho * Wo, C * ph * pw

    cdt = jnp.dtype(mxu_dtype) if mxu_dtype is not None else jnp.dtype(x.dtype)
    out_dtype = x.dtype
    Np = _round_up(N, _LANE)                 # lane-dense (unmasked) output stores

    budget, vmem_limit = _vmem_budget_and_limit()

    if fuse_im2col is None:
        fuse_im2col = _auto_fuse(B, Ho, C, ph, M, K, jnp.dtype(cdt).itemsize)

    # Bias pre-cast to the f32 accumulate dtype, lane-padded, kept resident.
    b_mat = bias.astype(jnp.float32)
    if Np != N:
        b_mat = jnp.pad(b_mat, (0, Np - N))
    b_mat = b_mat.reshape(1, Np)

    if fuse_im2col:
        def _run(single_buffer_resident):
            return _patch_embed_fused(x, weight, b_mat, ph, pw, Np, cdt,
                                      out_dtype, vmem_limit,
                                      single_buffer_resident, core_parallel)
    else:
        def _run(single_buffer_resident):
            return _patch_embed_im2col(x, weight, b_mat, ph, pw, Np, cdt,
                                       out_dtype, budget, vmem_limit, tile_m,
                                       single_buffer_resident, stream_buffers,
                                       core_parallel)

    try:
        return _run(True)
    except Exception:
        # pl.Buffered(1) on the resident weight/bias is a pure VMEM optimization;
        # fall back to default double-buffering if this jax/Mosaic combo rejects it.
        return _run(False)


if __name__ == "__main__":
    # Small deterministic config consistent with the module:
    # img_size=16, patch_size=4, in_chans=4, embed_dim=32, batch=2.
    B, C, H, W = 2, 4, 16, 16
    patch_size = 4
    embed_dim = 32

    key = jax.random.PRNGKey(0)
    kx, kw, kb = jax.random.split(key, 3)
    x = jax.random.normal(kx, (B, C, H, W), dtype=jnp.float32)
    weight = 0.05 * jax.random.normal(
        kw, (embed_dim, C, patch_size, patch_size), dtype=jnp.float32)
    bias = 0.05 * jax.random.normal(kb, (embed_dim,), dtype=jnp.float32)

    # Reference: the actual strided conv, flattened/transposed like PyTorch.
    ref = jax.lax.conv_general_dilated(
        x, weight, window_strides=(patch_size, patch_size), padding="VALID",
        dimension_numbers=("NCHW", "OIHW", "NCHW"),
    ) + bias[None, :, None, None]
    ref = ref.reshape(B, embed_dim, -1).transpose(0, 2, 1)
    n_patches = (H // patch_size) * (W // patch_size)

    # 1) im2col + matmul path, f32 MXU operands.
    out_f32 = jax.block_until_ready(
        patch_embed(x, weight, bias, patch_size, mxu_dtype=jnp.float32))
    assert out_f32.shape == (B, n_patches, embed_dim)
    assert jnp.allclose(out_f32, ref, atol=1e-2, rtol=1e-2)

    # 2) default path (bf16 MXU operands, f32 accumulation).
    out_def = jax.block_until_ready(patch_embed(x, weight, bias, patch_size))
    assert out_def.shape == (B, n_patches, embed_dim)
    assert jnp.allclose(out_def, ref, atol=5e-2, rtol=5e-2)

    # 3) fused im2col path (no HBM patch matrix), f32 operands.
    out_fused = jax.block_until_ready(
        patch_embed(x, weight, bias, patch_size, fuse_im2col=True,
                    mxu_dtype=jnp.float32))
    assert out_fused.shape == (B, n_patches, embed_dim)
    assert jnp.allclose(out_fused, ref, atol=1e-2, rtol=1e-2)

    # 4) fused im2col path with bf16 operands.
    out_fused_bf16 = jax.block_until_ready(
        patch_embed(x, weight, bias, patch_size, fuse_im2col=True))
    assert out_fused_bf16.shape == (B, n_patches, embed_dim)
    assert jnp.allclose(out_fused_bf16, ref, atol=5e-2, rtol=5e-2)

    print("KERNEL_OK")
</pallas_src>

<mosaic_0001>
module attributes {stable_mosaic.version = 11 : i64} {
  func.func @_matmul_bias_kernel(%arg0: i32, %arg1: memref<128x128xf32, #tpu.memory_space<vmem>>, %arg2: memref<128x128xf32, #tpu.memory_space<vmem>>, %arg3: memref<1x128xf32, #tpu.memory_space<vmem>>, %arg4: memref<128x128xf32, #tpu.memory_space<vmem>>) attributes {dimension_semantics = [#tpu.dimension_semantics<parallel>], iteration_bounds = array<i64: 1>, scalar_prefetch = 0 : i64, scratch_operands = 0 : i64, tpu.core_type = #tpu.core_type<tc>, window_params = [{transform_indices = @transform_0, window_bounds = array<i64: 128, 128>}, {pipeline_mode = #tpu.pipeline_mode<synchronous>, transform_indices = @transform_1, window_bounds = array<i64: 128, 128>}, {pipeline_mode = #tpu.pipeline_mode<synchronous>, transform_indices = @transform_2, window_bounds = array<i64: 1, 128>}, {transform_indices = @transform_3, window_bounds = array<i64: 128, 128>}]} {
    %c0 = arith.constant 0 : index
    %c0_0 = arith.constant 0 : index
    %0 = vector.load %arg1[%c0, %c0_0] : memref<128x128xf32, #tpu.memory_space<vmem>>, vector<128x128xf32>
    %c0_1 = arith.constant 0 : index
    %c0_2 = arith.constant 0 : index
    %1 = vector.load %arg2[%c0_1, %c0_2] : memref<128x128xf32, #tpu.memory_space<vmem>>, vector<128x128xf32>
    %cst = arith.constant dense<0.000000e+00> : vector<128x128xf32>
    %2 = tpu.matmul %0, %1, %cst {dimension_numbers = #tpu.dot_dimension_numbers<[1], [0], [0], [1], [0, 0, 1, 1], [], []>} : vector<128x128xf32>, vector<128x128xf32>, vector<128x128xf32> -> vector<128x128xf32>
    %c0_3 = arith.constant 0 : index
    %c0_4 = arith.constant 0 : index
    %3 = vector.load %arg3[%c0_3, %c0_4] : memref<1x128xf32, #tpu.memory_space<vmem>>, vector<1x128xf32>
    %4 = vector.broadcast %3 : vector<1x128xf32> to vector<128x128xf32>
    %5 = arith.addf %2, %4 : vector<128x128xf32>
    %c0_5 = arith.constant 0 : index
    %c0_6 = arith.constant 0 : index
    %6 = vector.load %arg4[%c0_5, %c0_6] : memref<128x128xf32, #tpu.memory_space<vmem>>, vector<128x128xf32>
    tpu.vector_store %arg4[%c0_5, %c0_6], %5 {strides = array<i32>} : memref<128x128xf32, #tpu.memory_space<vmem>>, vector<128x128xf32>,
    return
  }
  func.func @transform_0(%arg0: i32) -> (i32, i32) {
    %c0_i32 = arith.constant 0 : i32
    %c0_i32_0 = arith.constant 0 : i32
    return %arg0, %c0_i32 : i32, i32
  }
  func.func @transform_1(%arg0: i32) -> (i32, i32) {
    %c0_i32 = arith.constant 0 : i32
    %c0_i32_0 = arith.constant 0 : i32
    %c0_i32_1 = arith.constant 0 : i32
    return %c0_i32, %c0_i32_0 : i32, i32
  }
  func.func @transform_2(%arg0: i32) -> (i32, i32) {
    %c0_i32 = arith.constant 0 : i32
    %c0_i32_0 = arith.constant 0 : i32
    %c0_i32_1 = arith.constant 0 : i32
    return %c0_i32, %c0_i32_0 : i32, i32
  }
  func.func @transform_3(%arg0: i32) -> (i32, i32) {
    %c0_i32 = arith.constant 0 : i32
    %c0_i32_0 = arith.constant 0 : i32
    return %arg0, %c0_i32 : i32, i32
  }
}

module attributes {stable_mosaic.version = 11 : i64} {
  func.func @_matmul_bias_kernel(%arg0: i32, %arg1: memref<128x128xf32, #tpu.memory_space<vmem>>, %arg2: memref<128x128xf32, #tpu.memory_space<vmem>>, %arg3: memref<1x128xf32, #tpu.memory_space<vmem>>, %arg4: memref<128x128xf32, #tpu.memory_space<vmem>>) attributes {dimension_semantics = [#tpu.dimension_semantics<parallel>], iteration_bounds = array<i64: 1>, scalar_prefetch = 0 : i64, scratch_operands = 0 : i64, tpu.core_type = #tpu.core_type<tc>, window_params = [{transform_indices = @transform_0, window_bounds = array<i64: 128, 128>}, {pipeline_mode = #tpu.pipeline_mode<synchronous>, transform_indices = @transform_1, window_bounds = array<i64: 128, 128>}, {pipeline_mode = #tpu.pipeline_mode<synchronous>, transform_indices = @transform_2, window_bounds = array<i64: 1, 128>}, {transform_indices = @transform_3, window_bounds = array<i64: 128, 128>}]} {
    %c0 = arith.constant 0 : index
    %c0_0 = arith.constant 0 : index
    %0 = vector.load %arg1[%c0, %c0_0] : memref<128x128xf32, #tpu.memory_space<vmem>>, vector<128x128xf32>
    %c0_1 = arith.constant 0 : index
    %c0_2 = arith.constant 0 : index
    %1 = vector.load %arg2[%c0_1, %c0_2] : memref<128x128xf32, #tpu.memory_space<vmem>>, vector<128x128xf32>
    %cst = arith.constant dense<0.000000e+00> : vector<128x128xf32>
    %2 = tpu.matmul %0, %1, %cst {dimension_numbers = #tpu.dot_dimension_numbers<[1], [0], [0], [1], [0, 0, 1, 1], [], []>} : vector<128x128xf32>, vector<128x128xf32>, vector<128x128xf32> -> vector<128x128xf32>
    %c0_3 = arith.constant 0 : index
    %c0_4 = arith.constant 0 : index
    %3 = vector.load %arg3[%c0_3, %c0_4] : memref<1x128xf32, #tpu.memory_space<vmem>>, vector<1x128xf32>
    %4 = vector.broadcast %3 : vector<1x128xf32> to vector<128x128xf32>
    %5 = arith.addf %2, %4 : vector<128x128xf32>
    %c0_5 = arith.constant 0 : index
    %c0_6 = arith.constant 0 : index
    %6 = vector.load %arg4[%c0_5, %c0_6] : memref<128x128xf32, #tpu.memory_space<vmem>>, vector<128x128xf32>
    tpu.vector_store %arg4[%c0_5, %c0_6], %5 {strides = array<i32>} : memref<128x128xf32, #tpu.memory_space<vmem>>, vector<128x128xf32>,
    return
  }
  func.func @transform_0(%arg0: i32) -> (i32, i32) {
    %c0_i32 = arith.constant 0 : i32
    %c0_i32_0 = arith.constant 0 : i32
    return %arg0, %c0_i32 : i32, i32
  }
  func.func @transform_1(%arg0: i32) -> (i32, i32) {
    %c0_i32 = arith.constant 0 : i32
    %c0_i32_0 = arith.constant 0 : i32
    %c0_i32_1 = arith.constant 0 : i32
    return %c0_i32, %c0_i32_0 : i32, i32
  }
  func.func @transform_2(%arg0: i32) -> (i32, i32) {
    %c0_i32 = arith.constant 0 : i32
    %c0_i32_0 = arith.constant 0 : i32
    %c0_i32_1 = arith.constant 0 : i32
    return %c0_i32, %c0_i32_0 : i32, i32
  }
  func.func @transform_3(%arg0: i32) -> (i32, i32) {
    %c0_i32 = arith.constant 0 : i32
    %c0_i32_0 = arith.constant 0 : i32
    return %arg0, %c0_i32 : i32, i32
  }
}

</mosaic_0001>

<bundles_post_ra>
// kernel: tpu_custom_call.1
= control target key start
LH: loop header
LB: loop body
LE: loop exit
PB: predicated region body
PF: predicated region fallthrough
CT: control target
= control target key end

     0   :  { %8 = vsyncpa [#allocation3], 0  ;;  %s362_s0 = inlined_call_operand.hbm [shape: f32[128,128], index: 0, kind: input, shape index: {}]   ;;  %s363_s1 = inlined_call_operand.hbm [shape: f32[128,128], index: 1, kind: input, shape index: {}]   ;;  %s364_s2 = inlined_call_operand.vmem [shape: f32[1,128], index: 2, kind: input, shape index: {}]   ;;  %s365_s3 = inlined_call_operand.hbm [shape: f32[128,128], index: 3, kind: output, shape index: {}]  }
   0x1   :  { %9 = vsyncpa [#allocation6], 0 }
   0x2   :  { %10 = vsyncpa [#allocation4], 0  ;;  %s15_s14 = sshll.u32 %s362_s0, 4  ;;  %s316_s15 = smov [#allocation2]   ;;  %s16_s14 = int_to_ptr.hbm [resolvable:$true] %s15_s14 }
   0x3   :  { %s17_s16 = sshll.u32 %s316_s15, 4  ;;  %s28_s19 = sshll.u32 %s363_s1, 4  ;;  %s18_s16 = int_to_ptr.vmem [resolvable:$true] %s17_s16  ;;  %s29_s19 = int_to_ptr.hbm [resolvable:$true] %s28_s19 }
   0x4   :  { %s317_s20 = smov 128   ;;  %s318_s21 = smov 8  }
   0x5   :  { %23 = dma.hbm_to_vmem [thread:$0]  %s16_s14, 2048, %s18_s16, [#allocation3], %s317_s20, %s317_s20, %s318_s21  }
   0x6   :  { %s319_s22 = smov [#allocation5]  }
   0x7   :  { %s30_s23 = sshll.u32 %s319_s22, 4  ;;  %s31_s23 = int_to_ptr.vmem [resolvable:$true] %s30_s23 }
   0x8   :  { %36 = dma.hbm_to_vmem [thread:$0]  %s29_s19, 2048, %s31_s23, [#allocation6], %s317_s20, %s317_s20, %s318_s21  }
   0x9   :  { %310 = dma.done.wait [#allocation3], 2048  }
   0xa   :  { %311 = vsyncadd [#allocation3], 4294965248 }
   0xb   :  { %312 = dma.done.wait [#allocation6], 2048  }
   0xc   :  { %313 = vsyncadd [#allocation6], 4294965248  ;;  %v78_v0 = vld [vmem:[#allocation5 + $0x78] sm:$0xff]  ;;  %v77_v1 = vld [vmem:[#allocation5 + $0x70] sm:$0xff]  ;;  %s170_s27 = sshll.u32 %s365_s3, 4  ;;  %s171_s27 = int_to_ptr.hbm [resolvable:$true] %s170_s27 }
   0xd   :  { %185 = vmatpush.msra.mxu2 %v78_v0  ;;  %186 = vmatpush.msra.mxu3 %v78_v0  ;;  %v76_v2 = vld [vmem:[#allocation5 + $0x68] sm:$0xff]  ;;  %v75_v3 = vld [vmem:[#allocation5 + $0x60] sm:$0xff]  ;;  %v74_v4 = vld [vmem:[#allocation5 + $0x58] sm:$0xff] }
   0xe   :  { %83 = vmatpush.msra.mxu0 %v78_v0  ;;  %184 = vmatpush.msra.mxu1 %v78_v0  ;;  %v73_v5 = vld [vmem:[#allocation5 + $0x50] sm:$0xff]  ;;  %v72_v6 = vld [vmem:[#allocation5 + $0x48] sm:$0xff]  ;;  %v71_v7 = vld [vmem:[#allocation5 + $0x40] sm:$0xff] }
   0xf   :  { %188 = vmatpush.msra.mxu2 %v77_v1  ;;  %189 = vmatpush.msra.mxu3 %v77_v1  ;;  %v70_v8 = vld [vmem:[#allocation5 + $0x38] sm:$0xff]  ;;  %v69_v9 = vld [vmem:[#allocation5 + $0x30] sm:$0xff]  ;;  %v68_v10 = vld [vmem:[#allocation5 + $0x28] sm:$0xff] }
  0x10   :  { %84 = vmatpush.msra.mxu0 %v77_v1  ;;  %187 = vmatpush.msra.mxu1 %v77_v1  ;;  %v67_v11 = vld [vmem:[#allocation5 + $0x20] sm:$0xff]  ;;  %v66_v12 = vld [vmem:[#allocation5 + $0x18] sm:$0xff]  ;;  %v65_v13 = vld [vmem:[#allocation5 + $0x10] sm:$0xff] }
  0x11   :  { %191 = vmatpush.msra.mxu2 %v76_v2  ;;  %192 = vmatpush.msra.mxu3 %v76_v2  ;;  %v64_v14 = vld [vmem:[#allocation5 + $0x8] sm:$0xff]  ;;  %v63_v15 = vld [vmem:[#allocation5] sm:$0xff]  ;;  %v57_v24 = vld [vmem:[#allocation2 + $0x50] sm:$0xff] }
  0x12   :  { %85 = vmatpush.msra.mxu0 %v76_v2  ;;  %190 = vmatpush.msra.mxu1 %v76_v2  ;;  %v55_v16 = vld [vmem:[#allocation2 + $0x40] sm:$0xff]  ;;  %v56_v20 = vld [vmem:[#allocation2 + $0x48] sm:$0xff]  ;;  %v61_v25 = vld [vmem:[#allocation2 + $0x70] sm:$0xff] }
  0x13   :  { %194 = vmatpush.msra.mxu2 %v75_v3  ;;  %195 = vmatpush.msra.mxu3 %v75_v3  ;;  %v59_v17 = vld [vmem:[#allocation2 + $0x60] sm:$0xff]  ;;  %v60_v21 = vld [vmem:[#allocation2 + $0x68] sm:$0xff]  ;;  %v49_v26 = vld [vmem:[#allocation2 + $0x10] sm:$0xff] }
  0x14   :  { %86 = vmatpush.msra.mxu0 %v75_v3  ;;  %193 = vmatpush.msra.mxu1 %v75_v3  ;;  %v47_v18 = vld [vmem:[#allocation2] sm:$0xff]  ;;  %v48_v22 = vld [vmem:[#allocation2 + $0x8] sm:$0xff]  ;;  %v53_v27 = vld [vmem:[#allocation2 + $0x30] sm:$0xff] }
  0x15   :  { %197 = vmatpush.msra.mxu2 %v74_v4  ;;  %198 = vmatpush.msra.mxu3 %v74_v4  ;;  %v51_v19 = vld [vmem:[#allocation2 + $0x20] sm:$0xff]  ;;  %v52_v23 = vld [vmem:[#allocation2 + $0x28] sm:$0xff]  ;;  %v58_v28 = vld [vmem:[#allocation2 + $0x58] sm:$0xff] }
  0x16   :  { %87 = vmatpush.msra.mxu0 %v74_v4  ;;  %196 = vmatpush.msra.mxu1 %v74_v4  ;;  %v62_v29 = vld [vmem:[#allocation2 + $0x78] sm:$0xff]  ;;  %v237_v32 = vld [vmem:[%s364_s2] ss:$0 sm:$0xff]  ;;  %s320_s2 = smov [#allocation7]  }
  0x17   :  { %200 = vmatpush.msra.mxu2 %v73_v5  ;;  %201 = vmatpush.msra.mxu3 %v73_v5  ;;  %v50_v30 = vld [vmem:[#allocation2 + $0x18] sm:$0xff]  ;;  %s168_s24 = sshll.u32 %s320_s2, 4  ;;  %s169_s24 = int_to_ptr.vmem [resolvable:$true] %s168_s24 }
  0x18   :  { %88 = vmatpush.msra.mxu0 %v73_v5  ;;  %199 = vmatpush.msra.mxu1 %v73_v5  ;;  %v54_v31 = vld [vmem:[#allocation2 + $0x38] sm:$0xff] }
  0x19   :  { %203 = vmatpush.msra.mxu2 %v72_v6  ;;  %204 = vmatpush.msra.mxu3 %v72_v6 }
  0x1a   :  { %89 = vmatpush.msra.mxu0 %v72_v6  ;;  %202 = vmatpush.msra.mxu1 %v72_v6 }
  0x1b   :  { %206 = vmatpush.msra.mxu2 %v71_v7  ;;  %207 = vmatpush.msra.mxu3 %v71_v7 }
  0x1c   :  { %90 = vmatpush.msra.mxu0 %v71_v7  ;;  %205 = vmatpush.msra.mxu1 %v71_v7 }
  0x1d   :  { %209 = vmatpush.msra.mxu2 %v70_v8  ;;  %210 = vmatpush.msra.mxu3 %v70_v8 }
  0x1e   :  { %91 = vmatpush.msra.mxu0 %v70_v8  ;;  %208 = vmatpush.msra.mxu1 %v70_v8 }
  0x1f   :  { %212 = vmatpush.msra.mxu2 %v69_v9  ;;  %213 = vmatpush.msra.mxu3 %v69_v9 }
  0x20   :  { %92 = vmatpush.msra.mxu0 %v69_v9  ;;  %211 = vmatpush.msra.mxu1 %v69_v9 }
  0x21   :  { %215 = vmatpush.msra.mxu2 %v68_v10  ;;  %216 = vmatpush.msra.mxu3 %v68_v10 }
  0x22   :  { %93 = vmatpush.msra.mxu0 %v68_v10  ;;  %214 = vmatpush.msra.mxu1 %v68_v10 }
  0x23   :  { %218 = vmatpush.msra.mxu2 %v67_v11  ;;  %219 = vmatpush.msra.mxu3 %v67_v11 }
  0x24   :  { %94 = vmatpush.msra.mxu0 %v67_v11  ;;  %217 = vmatpush.msra.mxu1 %v67_v11 }
  0x25   :  { %221 = vmatpush.msra.mxu2 %v66_v12  ;;  %222 = vmatpush.msra.mxu3 %v66_v12 }
  0x26   :  { %95 = vmatpush.msra.mxu0 %v66_v12  ;;  %220 = vmatpush.msra.mxu1 %v66_v12 }
  0x27   :  { %224 = vmatpush.msra.mxu2 %v65_v13  ;;  %225 = vmatpush.msra.mxu3 %v65_v13 }
  0x28   :  { %96 = vmatpush.msra.mxu0 %v65_v13  ;;  %223 = vmatpush.msra.mxu1 %v65_v13 }
  0x29   :  { %227 = vmatpush.msra.mxu2 %v64_v14  ;;  %228 = vmatpush.msra.mxu3 %v64_v14 }
  0x2a   :  { %97 = vmatpush.msra.mxu0 %v64_v14  ;;  %226 = vmatpush.msra.mxu1 %v64_v14 }
  0x2b   :  { %230 = vmatpush.msra.mxu2 %v63_v15  ;;  %231 = vmatpush.msra.mxu3 %v63_v15 }
  0x2c   :  { %123 = vmatmul.f32.vlgmr.msra.gmra.mxu2 %v55_v16  ;;  %135 = vmatmul.f32.vlgmr.msra.gmra.mxu3 %v59_v17 }
  0x2d   :  { %98 = vmatpush.msra.mxu0 %v63_v15  ;;  %229 = vmatpush.msra.mxu1 %v63_v15 }
  0x2e   :  { %99 = vmatmul.f32.vlgmr.msra.gmra.mxu0 %v47_v18  ;;  %111 = vmatmul.f32.vlgmr.msra.gmra.mxu1 %v51_v19 }
  0x34   :  { %126 = vmatmul.f32.gmra.mxu2 %v56_v20  ;;  %138 = vmatmul.f32.gmra.mxu3 %v60_v21 }
  0x36   :  { %102 = vmatmul.f32.gmra.mxu0 %v48_v22  ;;  %114 = vmatmul.f32.gmra.mxu1 %v52_v23 }
  0x3c   :  { %129 = vmatmul.f32.gmra.mxu2 %v57_v24  ;;  %141 = vmatmul.f32.gmra.mxu3 %v61_v25 }
  0x3e   :  { %105 = vmatmul.f32.gmra.mxu0 %v49_v26  ;;  %117 = vmatmul.f32.gmra.mxu1 %v53_v27 }
  0x44   :  { %132 = vmatmul.f32.gmra.mxu2 %v58_v28  ;;  %144 = vmatmul.f32.gmra.mxu3 %v62_v29 }
  0x46   :  { %108 = vmatmul.f32.gmra.mxu0 %v50_v30  ;;  %120 = vmatmul.f32.gmra.mxu1 %v54_v31 }
  0xab   :  { %v100_v33 = vpop.f32.mrf.mxu0  ;;  %v112_v34 = vpop.f32.mrf.mxu1 }
  0xac   :  { %v101_v35 = vadd.f32 %v237_v32, %v100_v33  ;;  %v113_v36 = vadd.f32 %v237_v32, %v112_v34 }
  0xae   :  { %148 = vst [vmem:[#allocation7] sm:$0xff] %v101_v35 }
  0xaf   :  { %152 = vst [vmem:[#allocation7 + $0x20] sm:$0xff] %v113_v36  ;;  %v124_v37 = vpop.f32.mrf.mxu2  ;;  %v136_v38 = vpop.f32.mrf.mxu3 }
  0xb0   :  { %v125_v39 = vadd.f32 %v237_v32, %v124_v37  ;;  %v137_v40 = vadd.f32 %v237_v32, %v136_v38 }
  0xb2   :  { %156 = vst [vmem:[#allocation7 + $0x40] sm:$0xff] %v125_v39 }
  0xb3   :  { %160 = vst [vmem:[#allocation7 + $0x60] sm:$0xff] %v137_v40  ;;  %v103_v41 = vpop.f32.mrf.mxu0  ;;  %v115_v42 = vpop.f32.mrf.mxu1 }
  0xb4   :  { %v104_v43 = vadd.f32 %v237_v32, %v103_v41  ;;  %v116_v44 = vadd.f32 %v237_v32, %v115_v42 }
  0xb6   :  { %149 = vst [vmem:[#allocation7 + $0x8] sm:$0xff] %v104_v43 }
  0xb7   :  { %153 = vst [vmem:[#allocation7 + $0x28] sm:$0xff] %v116_v44  ;;  %v127_v45 = vpop.f32.mrf.mxu2  ;;  %v139_v46 = vpop.f32.mrf.mxu3 }
  0xb8   :  { %v128_v47 = vadd.f32 %v237_v32, %v127_v45  ;;  %v140_v48 = vadd.f32 %v237_v32, %v139_v46 }
  0xba   :  { %157 = vst [vmem:[#allocation7 + $0x48] sm:$0xff] %v128_v47 }
  0xbb   :  { %161 = vst [vmem:[#allocation7 + $0x68] sm:$0xff] %v140_v48  ;;  %v106_v49 = vpop.f32.mrf.mxu0  ;;  %v118_v50 = vpop.f32.mrf.mxu1 }
  0xbc   :  { %v107_v51 = vadd.f32 %v237_v32, %v106_v49  ;;  %v119_v52 = vadd.f32 %v237_v32, %v118_v50 }
  0xbe   :  { %150 = vst [vmem:[#allocation7 + $0x10] sm:$0xff] %v107_v51 }
  0xbf   :  { %154 = vst [vmem:[#allocation7 + $0x30] sm:$0xff] %v119_v52  ;;  %v130_v53 = vpop.f32.mrf.mxu2  ;;  %v142_v54 = vpop.f32.mrf.mxu3 }
  0xc0   :  { %v131_v55 = vadd.f32 %v237_v32, %v130_v53  ;;  %v143_v56 = vadd.f32 %v237_v32, %v142_v54 }
  0xc2   :  { %158 = vst [vmem:[#allocation7 + $0x50] sm:$0xff] %v131_v55 }
  0xc3   :  { %162 = vst [vmem:[#allocation7 + $0x70] sm:$0xff] %v143_v56  ;;  %v109_v57 = vpop.f32.mrf.mxu0  ;;  %v121_v58 = vpop.f32.mrf.mxu1 }
  0xc4   :  { %v110_v59 = vadd.f32 %v237_v32, %v109_v57  ;;  %v122_v60 = vadd.f32 %v237_v32, %v121_v58 }
  0xc6   :  { %151 = vst [vmem:[#allocation7 + $0x18] sm:$0xff] %v110_v59 }
  0xc7   :  { %155 = vst [vmem:[#allocation7 + $0x38] sm:$0xff] %v122_v60  ;;  %v133_v61 = vpop.f32.mrf.mxu2  ;;  %v145_v62 = vpop.f32.mrf.mxu3 }
  0xc8   :  { %v134_v63 = vadd.f32 %v237_v32, %v133_v61  ;;  %v146_v0 = vadd.f32 %v237_v32, %v145_v62 }
  0xca   :  { %159 = vst [vmem:[#allocation7 + $0x58] sm:$0xff] %v134_v63 }
  0xcb   :  { %163 = vst [vmem:[#allocation7 + $0x78] sm:$0xff] %v146_v0 }
  0xcc   :  { %176 = dma.vmem_to_hbm [thread:$0]  %s169_s24, 2048, %s171_s27, [#allocation4], %s317_s20, %s317_s20, %s318_s21  }
  0xcd   :  { %314 = dma.done.wait [#allocation4], 2048  }
  0xce   :  { %315 = vsyncadd [#allocation4], 4294965248 }
  0xcf   :  { %181 = vsyncpa [#allocation3], 1 }
  0xd0   :  { %182 = vsyncpa [#allocation6], 1 }
  0xd1   :  { %183 = vsyncpa [#allocation4], 1 }

// kernel: tpu_custom_call.1
= control target key start
LH: loop header
LB: loop body
LE: loop exit
PB: predicated region body
PF: predicated region fallthrough
CT: control target
= control target key end

     0   :  { %8 = vsyncpa [#allocation3], 0  ;;  %s362_s0 = inlined_call_operand.hbm [shape: f32[128,128], index: 0, kind: input, shape index: {}]   ;;  %s363_s1 = inlined_call_operand.hbm [shape: f32[128,128], index: 1, kind: input, shape index: {}]   ;;  %s364_s2 = inlined_call_operand.vmem [shape: f32[1,128], index: 2, kind: input, shape index: {}]   ;;  %s365_s3 = inlined_call_operand.hbm [shape: f32[128,128], index: 3, kind: output, shape index: {}]  }
   0x1   :  { %9 = vsyncpa [#allocation6], 0 }
   0x2   :  { %10 = vsyncpa [#allocation4], 0  ;;  %s15_s14 = sshll.u32 %s362_s0, 4  ;;  %s316_s15 = smov [#allocation2]   ;;  %s16_s14 = int_to_ptr.hbm [resolvable:$true] %s15_s14 }
   0x3   :  { %s17_s16 = sshll.u32 %s316_s15, 4  ;;  %s28_s19 = sshll.u32 %s363_s1, 4  ;;  %s18_s16 = int_to_ptr.vmem [resolvable:$true] %s17_s16  ;;  %s29_s19 = int_to_ptr.hbm [resolvable:$true] %s28_s19 }
   0x4   :  { %s317_s20 = smov 128   ;;  %s318_s21 = smov 8  }
   0x5   :  { %23 = dma.hbm_to_vmem [thread:$0]  %s16_s14, 2048, %s18_s16, [#allocation3], %s317_s20, %s317_s20, %s318_s21  }
   0x6   :  { %s319_s22 = smov [#allocation5]  }
   0x7   :  { %s30_s23 = sshll.u32 %s319_s22, 4  ;;  %s31_s23 = int_to_ptr.vmem [resolvable:$true] %s30_s23 }
   0x8   :  { %36 = dma.hbm_to_vmem [thread:$0]  %s29_s19, 2048, %s31_s23, [#allocation6], %s317_s20, %s317_s20, %s318_s21  }
   0x9   :  { %310 = dma.done.wait [#allocation3], 2048  }
   0xa   :  { %311 = vsyncadd [#allocation3], 4294965248 }
   0xb   :  { %312 = dma.done.wait [#allocation6], 2048  }
   0xc   :  { %313 = vsyncadd [#allocation6], 4294965248  ;;  %v78_v0 = vld [vmem:[#allocation5 + $0x78] sm:$0xff]  ;;  %v77_v1 = vld [vmem:[#allocation5 + $0x70] sm:$0xff]  ;;  %s170_s27 = sshll.u32 %s365_s3, 4  ;;  %s171_s27 = int_to_ptr.hbm [resolvable:$true] %s170_s27 }
   0xd   :  { %185 = vmatpush.msra.mxu2 %v78_v0  ;;  %186 = vmatpush.msra.mxu3 %v78_v0  ;;  %v76_v2 = vld [vmem:[#allocation5 + $0x68] sm:$0xff]  ;;  %v75_v3 = vld [vmem:[#allocation5 + $0x60] sm:$0xff]  ;;  %v74_v4 = vld [vmem:[#allocation5 + $0x58] sm:$0xff] }
   0xe   :  { %83 = vmatpush.msra.mxu0 %v78_v0  ;;  %184 = vmatpush.msra.mxu1 %v78_v0  ;;  %v73_v5 = vld [vmem:[#allocation5 + $0x50] sm:$0xff]  ;;  %v72_v6 = vld [vmem:[#allocation5 + $0x48] sm:$0xff]  ;;  %v71_v7 = vld [vmem:[#allocation5 + $0x40] sm:$0xff] }
   0xf   :  { %188 = vmatpush.msra.mxu2 %v77_v1  ;;  %189 = vmatpush.msra.mxu3 %v77_v1  ;;  %v70_v8 = vld [vmem:[#allocation5 + $0x38] sm:$0xff]  ;;  %v69_v9 = vld [vmem:[#allocation5 + $0x30] sm:$0xff]  ;;  %v68_v10 = vld [vmem:[#allocation5 + $0x28] sm:$0xff] }
  0x10   :  { %84 = vmatpush.msra.mxu0 %v77_v1  ;;  %187 = vmatpush.msra.mxu1 %v77_v1  ;;  %v67_v11 = vld [vmem:[#allocation5 + $0x20] sm:$0xff]  ;;  %v66_v12 = vld [vmem:[#allocation5 + $0x18] sm:$0xff]  ;;  %v65_v13 = vld [vmem:[#allocation5 + $0x10] sm:$0xff] }
  0x11   :  { %191 = vmatpush.msra.mxu2 %v76_v2  ;;  %192 = vmatpush.msra.mxu3 %v76_v2  ;;  %v64_v14 = vld [vmem:[#allocation5 + $0x8] sm:$0xff]  ;;  %v63_v15 = vld [vmem:[#allocation5] sm:$0xff]  ;;  %v57_v24 = vld [vmem:[#allocation2 + $0x50] sm:$0xff] }
  0x12   :  { %85 = vmatpush.msra.mxu0 %v76_v2  ;;  %190 = vmatpush.msra.mxu1 %v76_v2  ;;  %v55_v16 = vld [vmem:[#allocation2 + $0x40] sm:$0xff]  ;;  %v56_v20 = vld [vmem:[#allocation2 + $0x48] sm:$0xff]  ;;  %v61_v25 = vld [vmem:[#allocation2 + $0x70] sm:$0xff] }
  0x13   :  { %194 = vmatpush.msra.mxu2 %v75_v3  ;;  %195 = vmatpush.msra.mxu3 %v75_v3  ;;  %v59_v17 = vld [vmem:[#allocation2 + $0x60] sm:$0xff]  ;;  %v60_v21 = vld [vmem:[#allocation2 + $0x68] sm:$0xff]  ;;  %v49_v26 = vld [vmem:[#allocation2 + $0x10] sm:$0xff] }
  0x14   :  { %86 = vmatpush.msra.mxu0 %v75_v3  ;;  %193 = vmatpush.msra.mxu1 %v75_v3  ;;  %v47_v18 = vld [vmem:[#allocation2] sm:$0xff]  ;;  %v48_v22 = vld [vmem:[#allocation2 + $0x8] sm:$0xff]  ;;  %v53_v27 = vld [vmem:[#allocation2 + $0x30] sm:$0xff] }
  0x15   :  { %197 = vmatpush.msra.mxu2 %v74_v4  ;;  %198 = vmatpush.msra.mxu3 %v74_v4  ;;  %v51_v19 = vld [vmem:[#allocation2 + $0x20] sm:$0xff]  ;;  %v52_v23 = vld [vmem:[#allocation2 + $0x28] sm:$0xff]  ;;  %v58_v28 = vld [vmem:[#allocation2 + $0x58] sm:$0xff] }
  0x16   :  { %87 = vmatpush.msra.mxu0 %v74_v4  ;;  %196 = vmatpush.msra.mxu1 %v74_v4  ;;  %v62_v29 = vld [vmem:[#allocation2 + $0x78] sm:$0xff]  ;;  %v237_v32 = vld [vmem:[%s364_s2] ss:$0 sm:$0xff]  ;;  %s320_s2 = smov [#allocation7]  }
  0x17   :  { %200 = vmatpush.msra.mxu2 %v73_v5  ;;  %201 = vmatpush.msra.mxu3 %v73_v5  ;;  %v50_v30 = vld [vmem:[#allocation2 + $0x18] sm:$0xff]  ;;  %s168_s24 = sshll.u32 %s320_s2, 4  ;;  %s169_s24 = int_to_ptr.vmem [resolvable:$true] %s168_s24 }
  0x18   :  { %88 = vmatpush.msra.mxu0 %v73_v5  ;;  %199 = vmatpush.msra.mxu1 %v73_v5  ;;  %v54_v31 = vld [vmem:[#allocation2 + $0x38] sm:$0xff] }
  0x19   :  { %203 = vmatpush.msra.mxu2 %v72_v6  ;;  %204 = vmatpush.msra.mxu3 %v72_v6 }
  0x1a   :  { %89 = vmatpush.msra.mxu0 %v72_v6  ;;  %202 = vmatpush.msra.mxu1 %v72_v6 }
  0x1b   :  { %206 = vmatpush.msra.mxu2 %v71_v7  ;;  %207 = vmatpush.msra.mxu3 %v71_v7 }
  0x1c   :  { %90 = vmatpush.msra.mxu0 %v71_v7  ;;  %205 = vmatpush.msra.mxu1 %v71_v7 }
  0x1d   :  { %209 = vmatpush.msra.mxu2 %v70_v8  ;;  %210 = vmatpush.msra.mxu3 %v70_v8 }
  0x1e   :  { %91 = vmatpush.msra.mxu0 %v70_v8  ;;  %208 = vmatpush.msra.mxu1 %v70_v8 }
  0x1f   :  { %212 = vmatpush.msra.mxu2 %v69_v9  ;;  %213 = vmatpush.msra.mxu3 %v69_v9 }
  0x20   :  { %92 = vmatpush.msra.mxu0 %v69_v9  ;;  %211 = vmatpush.msra.mxu1 %v69_v9 }
  0x21   :  { %215 = vmatpush.msra.mxu2 %v68_v10  ;;  %216 = vmatpush.msra.mxu3 %v68_v10 }
  0x22   :  { %93 = vmatpush.msra.mxu0 %v68_v10  ;;  %214 = vmatpush.msra.mxu1 %v68_v10 }
  0x23   :  { %218 = vmatpush.msra.mxu2 %v67_v11  ;;  %219 = vmatpush.msra.mxu3 %v67_v11 }
  0x24   :  { %94 = vmatpush.msra.mxu0 %v67_v11  ;;  %217 = vmatpush.msra.mxu1 %v67_v11 }
  0x25   :  { %221 = vmatpush.msra.mxu2 %v66_v12  ;;  %222 = vmatpush.msra.mxu3 %v66_v12 }
  0x26   :  { %95 = vmatpush.msra.mxu0 %v66_v12  ;;  %220 = vmatpush.msra.mxu1 %v66_v12 }
  0x27   :  { %224 = vmatpush.msra.mxu2 %v65_v13  ;;  %225 = vmatpush.msra.mxu3 %v65_v13 }
  0x28   :  { %96 = vmatpush.msra.mxu0 %v65_v13  ;;  %223 = vmatpush.msra.mxu1 %v65_v13 }
  0x29   :  { %227 = vmatpush.msra.mxu2 %v64_v14  ;;  %228 = vmatpush.msra.mxu3 %v64_v14 }
  0x2a   :  { %97 = vmatpush.msra.mxu0 %v64_v14  ;;  %226 = vmatpush.msra.mxu1 %v64_v14 }
  0x2b   :  { %230 = vmatpush.msra.mxu2 %v63_v15  ;;  %231 = vmatpush.msra.mxu3 %v63_v15 }
  0x2c   :  { %123 = vmatmul.f32.vlgmr.msra.gmra.mxu2 %v55_v16  ;;  %135 = vmatmul.f32.vlgmr.msra.gmra.mxu3 %v59_v17 }
  0x2d   :  { %98 = vmatpush.msra.mxu0 %v63_v15  ;;  %229 = vmatpush.msra.mxu1 %v63_v15 }
  0x2e   :  { %99 = vmatmul.f32.vlgmr.msra.gmra.mxu0 %v47_v18  ;;  %111 = vmatmul.f32.vlgmr.msra.gmra.mxu1 %v51_v19 }
  0x34   :  { %126 = vmatmul.f32.gmra.mxu2 %v56_v20  ;;  %138 = vmatmul.f32.gmra.mxu3 %v60_v21 }
  0x36   :  { %102 = vmatmul.f32.gmra.mxu0 %v48_v22  ;;  %114 = vmatmul.f32.gmra.mxu1 %v52_v23 }
  0x3c   :  { %129 = vmatmul.f32.gmra.mxu2 %v57_v24  ;;  %141 = vmatmul.f32.gmra.mxu3 %v61_v25 }
  0x3e   :  { %105 = vmatmul.f32.gmra.mxu0 %v49_v26  ;;  %117 = vmatmul.f32.gmra.mxu1 %v53_v27 }
  0x44   :  { %132 = vmatmul.f32.gmra.mxu2 %v58_v28  ;;  %144 = vmatmul.f32.gmra.mxu3 %v62_v29 }
  0x46   :  { %108 = vmatmul.f32.gmra.mxu0 %v50_v30  ;;  %120 = vmatmul.f32.gmra.mxu1 %v54_v31 }
  0xab   :  { %v100_v33 = vpop.f32.mrf.mxu0  ;;  %v112_v34 = vpop.f32.mrf.mxu1 }
  0xac   :  { %v101_v35 = vadd.f32 %v237_v32, %v100_v33  ;;  %v113_v36 = vadd.f32 %v237_v32, %v112_v34 }
  0xae   :  { %148 = vst [vmem:[#allocation7] sm:$0xff] %v101_v35 }
  0xaf   :  { %152 = vst [vmem:[#allocation7 + $0x20] sm:$0xff] %v113_v36  ;;  %v124_v37 = vpop.f32.mrf.mxu2  ;;  %v136_v38 = vpop.f32.mrf.mxu3 }
  0xb0   :  { %v125_v39 = vadd.f32 %v237_v32, %v124_v37  ;;  %v137_v40 = vadd.f32 %v237_v32, %v136_v38 }
  0xb2   :  { %156 = vst [vmem:[#allocation7 + $0x40] sm:$0xff] %v125_v39 }
  0xb3   :  { %160 = vst [vmem:[#allocation7 + $0x60] sm:$0xff] %v137_v40  ;;  %v103_v41 = vpop.f32.mrf.mxu0  ;;  %v115_v42 = vpop.f32.mrf.mxu1 }
  0xb4   :  { %v104_v43 = vadd.f32 %v237_v32, %v103_v41  ;;  %v116_v44 = vadd.f32 %v237_v32, %v115_v42 }
  0xb6   :  { %149 = vst [vmem:[#allocation7 + $0x8] sm:$0xff] %v104_v43 }
  0xb7   :  { %153 = vst [vmem:[#allocation7 + $0x28] sm:$0xff] %v116_v44  ;;  %v127_v45 = vpop.f32.mrf.mxu2  ;;  %v139_v46 = vpop.f32.mrf.mxu3 }
  0xb8   :  { %v128_v47 = vadd.f32 %v237_v32, %v127_v45  ;;  %v140_v48 = vadd.f32 %v237_v32, %v139_v46 }
  0xba   :  { %157 = vst [vmem:[#allocation7 + $0x48] sm:$0xff] %v128_v47 }
  0xbb   :  { %161 = vst [vmem:[#allocation7 + $0x68] sm:$0xff] %v140_v48  ;;  %v106_v49 = vpop.f32.mrf.mxu0  ;;  %v118_v50 = vpop.f32.mrf.mxu1 }
  0xbc   :  { %v107_v51 = vadd.f32 %v237_v32, %v106_v49  ;;  %v119_v52 = vadd.f32 %v237_v32, %v118_v50 }
  0xbe   :  { %150 = vst [vmem:[#allocation7 + $0x10] sm:$0xff] %v107_v51 }
  0xbf   :  { %154 = vst [vmem:[#allocation7 + $0x30] sm:$0xff] %v119_v52  ;;  %v130_v53 = vpop.f32.mrf.mxu2  ;;  %v142_v54 = vpop.f32.mrf.mxu3 }
  0xc0   :  { %v131_v55 = vadd.f32 %v237_v32, %v130_v53  ;;  %v143_v56 = vadd.f32 %v237_v32, %v142_v54 }
  0xc2   :  { %158 = vst [vmem:[#allocation7 + $0x50] sm:$0xff] %v131_v55 }
  0xc3   :  { %162 = vst [vmem:[#allocation7 + $0x70] sm:$0xff] %v143_v56  ;;  %v109_v57 = vpop.f32.mrf.mxu0  ;;  %v121_v58 = vpop.f32.mrf.mxu1 }
  0xc4   :  { %v110_v59 = vadd.f32 %v237_v32, %v109_v57  ;;  %v122_v60 = vadd.f32 %v237_v32, %v121_v58 }
  0xc6   :  { %151 = vst [vmem:[#allocation7 + $0x18] sm:$0xff] %v110_v59 }
  0xc7   :  { %155 = vst [vmem:[#allocation7 + $0x38] sm:$0xff] %v122_v60  ;;  %v133_v61 = vpop.f32.mrf.mxu2  ;;  %v145_v62 = vpop.f32.mrf.mxu3 }
  0xc8   :  { %v134_v63 = vadd.f32 %v237_v32, %v133_v61  ;;  %v146_v0 = vadd.f32 %v237_v32, %v145_v62 }
  0xca   :  { %159 = vst [vmem:[#allocation7 + $0x58] sm:$0xff] %v134_v63 }
  0xcb   :  { %163 = vst [vmem:[#allocation7 + $0x78] sm:$0xff] %v146_v0 }
  0xcc   :  { %176 = dma.vmem_to_hbm [thread:$0]  %s169_s24, 2048, %s171_s27, [#allocation4], %s317_s20, %s317_s20, %s318_s21  }
  0xcd   :  { %314 = dma.done.wait [#allocation4], 2048  }
  0xce   :  { %315 = vsyncadd [#allocation4], 4294965248 }
  0xcf   :  { %181 = vsyncpa [#allocation3], 1 }
  0xd0   :  { %182 = vsyncpa [#allocation6], 1 }
  0xd1   :  { %183 = vsyncpa [#allocation4], 1 }

</bundles_post_ra>
